<compile_context>
chip_gen: v5e
topology: v5e:2x2
jax: 0.10.0
libtpu: 0.0.40
codegen_flags: <defaults>
</compile_context>

<pallas_src>
import functools

import jax
import jax.numpy as jnp
from jax.experimental import pallas as pl
from jax.experimental.pallas import tpu as pltpu


# =============================================================================
# Fused hierarchical-VAE kernel (all stages, all 18 matmuls, one store)
# =============================================================================
def _fused_hier_vae_kernel(x_ref, eps_ref,
                           w1_ref, b1_ref, w2_ref, b2_ref,
                           wh_ref, bh_ref, wd1_ref, bd1_ref, wd2_ref, bd2_ref,
                           out_ref, *, n_stages, input_dim, latent_dim):
    L = latent_dim
    IN = input_dim

    x = x_ref[...]                              # (TB, IN) f32
    x_bf = x.astype(jnp.bfloat16)               # MXU input

    pieces = []
    z_prev_bf = None
    for blk in range(n_stages):                 # statically unrolled hierarchy
        # ---- encoder layer 1: concat(x, z_prev) as two split matmuls --------
        h1 = jnp.dot(x_bf, w1_ref[blk, :IN, :],
                     preferred_element_type=jnp.float32)
        if blk > 0:
            h1 = h1 + jnp.dot(z_prev_bf, w1_ref[blk, IN:, :],
                              preferred_element_type=jnp.float32)
        h1 = jnp.maximum(h1 + b1_ref[blk:blk + 1, :], 0.0)

        # ---- encoder layer 2 -------------------------------------------------
        h2 = jnp.dot(h1.astype(jnp.bfloat16), w2_ref[blk],
                     preferred_element_type=jnp.float32)
        h2 = jnp.maximum(h2 + b2_ref[blk:blk + 1, :], 0.0)

        # ---- fused mu | logvar head ------------------------------------------
        ml = jnp.dot(h2.astype(jnp.bfloat16), wh_ref[blk],
                     preferred_element_type=jnp.float32) + bh_ref[blk:blk + 1, :]
        mu = ml[:, :L]
        logvar = ml[:, L:]

        # ---- reparameterize: z = mu + eps * exp(0.5 * logvar) ----------------
        eps = eps_ref[:, blk * L:(blk + 1) * L]
        z = mu + eps * jnp.exp(0.5 * logvar)
        z_bf = z.astype(jnp.bfloat16)

        # ---- decoder ----------------------------------------------------------
        d1 = jnp.dot(z_bf, wd1_ref[blk], preferred_element_type=jnp.float32)
        d1 = jnp.maximum(d1 + bd1_ref[blk:blk + 1, :], 0.0)
        recon = jnp.dot(d1.astype(jnp.bfloat16), wd2_ref[blk],
                        preferred_element_type=jnp.float32) + bd2_ref[blk:blk + 1, :]

        pieces += [z, mu, logvar, recon]
        z_prev_bf = z_bf

    # one lane-dense store of every stage output: [z | mu | logvar | recon] * 3
    out_ref[...] = jnp.concatenate(pieces, axis=-1)


# =============================================================================
# Parameter init (mimics nn.Linear uniform(-1/sqrt(fan_in), +1/sqrt(fan_in)))
# =============================================================================
def _init_linear(key, in_dim, out_dim):
    kw, kb = jax.random.split(key)
    bound = 1.0 / jnp.sqrt(jnp.float32(in_dim))
    w = jax.random.uniform(kw, (in_dim, out_dim), jnp.float32, -bound, bound)
    b = jax.random.uniform(kb, (out_dim,), jnp.float32, -bound, bound)
    return w, b


def init_vae_block_params(key, input_dim, latent_dim, hidden_dim):
    keys = jax.random.split(key, 6)
    w1, b1 = _init_linear(keys[0], input_dim, hidden_dim)
    w2, b2 = _init_linear(keys[1], hidden_dim, hidden_dim)
    wmu, bmu = _init_linear(keys[2], hidden_dim, latent_dim)
    wlv, blv = _init_linear(keys[3], hidden_dim, latent_dim)
    wd1, bd1 = _init_linear(keys[4], latent_dim, hidden_dim)
    wd2, bd2 = _init_linear(keys[5], hidden_dim, input_dim)
    return dict(w1=w1, b1=b1, w2=w2, b2=b2, wmu=wmu, bmu=bmu,
                wlv=wlv, blv=blv, wd1=wd1, bd1=bd1, wd2=wd2, bd2=bd2)


# =============================================================================
# Weight packing: per-layer slabs stacked over stages (weights bf16, biases f32)
# =============================================================================
def pack_hier_params(blocks, input_dim, latent_dim, hidden_dim):
    """blocks: list of per-stage param dicts in hierarchy order."""
    ext_in = input_dim + latent_dim   # extended encoder-in / decoder-out width
    w1s, b1s, w2s, b2s, whs, bhs, wd1s, bd1s, wd2s, bd2s = ([] for _ in range(10))
    for p in blocks:
        # belief: pad the (unused) z_prev rows of w1 with zeros
        w1 = p["w1"]
        if w1.shape[0] < ext_in:
            w1 = jnp.concatenate(
                [w1, jnp.zeros((ext_in - w1.shape[0], hidden_dim), jnp.float32)], axis=0)
        # belief: pad recon columns of wd2/bd2 with zeros (sliced off in wrapper)
        wd2, bd2 = p["wd2"], p["bd2"]
        if wd2.shape[1] < ext_in:
            pad = ext_in - wd2.shape[1]
            wd2 = jnp.concatenate([wd2, jnp.zeros((hidden_dim, pad), jnp.float32)], axis=1)
            bd2 = jnp.concatenate([bd2, jnp.zeros((pad,), jnp.float32)], axis=0)
        w1s.append(w1); b1s.append(p["b1"])
        w2s.append(p["w2"]); b2s.append(p["b2"])
        whs.append(jnp.concatenate([p["wmu"], p["wlv"]], axis=1))   # fused head weight
        bhs.append(jnp.concatenate([p["bmu"], p["blv"]], axis=0))   # fused head bias
        wd1s.append(p["wd1"]); bd1s.append(p["bd1"])
        wd2s.append(wd2); bd2s.append(bd2)

    stack_w = lambda xs: jnp.stack(xs).astype(jnp.bfloat16)   # MXU inputs
    stack_b = lambda xs: jnp.stack(xs).astype(jnp.float32)    # VPU adds stay f32
    return dict(w1=stack_w(w1s), b1=stack_b(b1s),
                w2=stack_w(w2s), b2=stack_b(b2s),
                wh=stack_w(whs), bh=stack_b(bhs),
                wd1=stack_w(wd1s), bd1=stack_b(bd1s),
                wd2=stack_w(wd2s), bd2=stack_b(bd2s))


# =============================================================================
# pallas_call wrapper
# =============================================================================
def hier_vae_fused_forward(x, eps, packed, *, n_stages, input_dim, latent_dim,
                           batch_tile=256):
    B = x.shape[0]
    L = latent_dim
    ext_in = input_dim + L
    stage_w = 3 * L + ext_in                 # z | mu | logvar | recon per stage
    out_w = n_stages * stage_w

    # Batch tiling: single full-array block for toy batches; 256-row tiles
    # (sized for v7x's 64 MiB VMEM and the 256-edge MXU) otherwise.
    if B <= batch_tile:
        TB, Bp = B, B
    else:
        TB = batch_tile
        Bp = ((B + TB - 1) // TB) * TB
        if Bp != B:
            pad = Bp - B
            x = jnp.concatenate([x, jnp.zeros((pad, input_dim), x.dtype)], axis=0)
            eps = jnp.concatenate([eps, jnp.zeros((pad, eps.shape[1]), eps.dtype)], axis=0)
    grid = (Bp // TB,)

    row = lambda i: (i, 0)
    const3 = lambda i: (0, 0, 0)             # weight slabs stay VMEM-resident
    const2 = lambda i: (0, 0)

    in_specs = [
        pl.BlockSpec((TB, input_dim), row),              # x
        pl.BlockSpec((TB, n_stages * L), row),           # eps
        pl.BlockSpec(packed["w1"].shape, const3),
        pl.BlockSpec(packed["b1"].shape, const2),
        pl.BlockSpec(packed["w2"].shape, const3),
        pl.BlockSpec(packed["b2"].shape, const2),
        pl.BlockSpec(packed["wh"].shape, const3),
        pl.BlockSpec(packed["bh"].shape, const2),
        pl.BlockSpec(packed["wd1"].shape, const3),
        pl.BlockSpec(packed["bd1"].shape, const2),
        pl.BlockSpec(packed["wd2"].shape, const3),
        pl.BlockSpec(packed["bd2"].shape, const2),
    ]

    kernel = functools.partial(_fused_hier_vae_kernel, n_stages=n_stages,
                               input_dim=input_dim, latent_dim=latent_dim)

    slab = pl.pallas_call(
        kernel,
        out_shape=jax.ShapeDtypeStruct((Bp, out_w), jnp.float32),
        grid=grid,
        in_specs=in_specs,
        out_specs=pl.BlockSpec((TB, out_w), row),
        compiler_params=pltpu.CompilerParams(
            dimension_semantics=("parallel",)),
    )(x, eps, packed["w1"], packed["b1"], packed["w2"], packed["b2"],
      packed["wh"], packed["bh"], packed["wd1"], packed["bd1"],
      packed["wd2"], packed["bd2"])
    return slab[:B]


# =============================================================================
# Hierarchical forward with ablation modes (wrapper-level glue)
# =============================================================================
def hierarchical_mind_state_vae_forward(x, all_params, eps_key, *,
                                        input_dim, latent_dim, hidden_dim,
                                        ablation_mode="full"):
    B = x.shape[0]
    L = latent_dim
    ext_in = input_dim + L

    stage_names = {"none": [],
                   "belief": ["belief"],
                   "belief_desire": ["belief", "desire"],
                   "full": ["belief", "desire", "intention"]}[ablation_mode]

    zeros_lat = jnp.zeros((B, L), jnp.float32)
    out = {
        "z_belief": zeros_lat, "mu_belief": zeros_lat, "logvar_belief": zeros_lat,
        "recon_belief": jnp.zeros_like(x),
        "z_desire": zeros_lat, "mu_desire": zeros_lat, "logvar_desire": zeros_lat,
        "recon_desire": jnp.zeros((B, ext_in), jnp.float32),
        "z_intention": zeros_lat, "mu_intention": zeros_lat, "logvar_intention": zeros_lat,
        "recon_intention": jnp.zeros((B, ext_in), jnp.float32),
    }
    n_stages = len(stage_names)
    if n_stages == 0:
        return out

    # single RNG call replaces the three per-stage randn_like calls
    # TODO(synk): could move eps generation in-kernel via pltpu.prng_seed/stateful_normal.
    eps = jax.random.normal(eps_key, (B, n_stages * L), jnp.float32)

    # In production pack once and reuse; cheap XLA concat/stack here.
    packed = pack_hier_params([all_params[n] for n in stage_names],
                              input_dim, latent_dim, hidden_dim)

    slab = hier_vae_fused_forward(x, eps, packed, n_stages=n_stages,
                                  input_dim=input_dim, latent_dim=latent_dim)

    stage_w = 3 * L + ext_in
    for k, name in enumerate(stage_names):
        o = k * stage_w
        recon = slab[:, o + 3 * L:o + stage_w]
        if name == "belief":
            recon = recon[:, :input_dim]           # drop zero-padded columns
        out[f"z_{name}"] = slab[:, o:o + L]
        out[f"mu_{name}"] = slab[:, o + L:o + 2 * L]
        out[f"logvar_{name}"] = slab[:, o + 2 * L:o + 3 * L]
        out[f"recon_{name}"] = recon
    return out


# =============================================================================
# Pure-JAX (f32) reference for correctness checking
# =============================================================================
def _ref_forward(x, all_params, eps, stage_names, latent_dim):
    L = latent_dim
    outs, z_prev = {}, None
    for k, name in enumerate(stage_names):
        p = all_params[name]
        inp = x if z_prev is None else jnp.concatenate([x, z_prev], axis=-1)
        h = jax.nn.relu(inp @ p["w1"] + p["b1"])
        h = jax.nn.relu(h @ p["w2"] + p["b2"])
        mu = h @ p["wmu"] + p["bmu"]
        logvar = h @ p["wlv"] + p["blv"]
        z = mu + eps[:, k * L:(k + 1) * L] * jnp.exp(0.5 * logvar)
        d = jax.nn.relu(z @ p["wd1"] + p["bd1"])
        recon = d @ p["wd2"] + p["bd2"]
        outs[name] = (z, mu, logvar, recon)
        z_prev = z
    return outs


if __name__ == "__main__":
    # small shapes consistent with the module: batch=2, input_dim=16,
    # latent_dim=8, hidden_dim=32, ablation_mode='full'
    B, INPUT_DIM, LATENT_DIM, HIDDEN_DIM = 2, 16, 8, 32

    root = jax.random.PRNGKey(0)
    k_x, k_belief, k_desire, k_intent, k_eps = jax.random.split(root, 5)

    x = jax.random.normal(k_x, (B, INPUT_DIM), jnp.float32)
    all_params = {
        "belief": init_vae_block_params(k_belief, INPUT_DIM, LATENT_DIM, HIDDEN_DIM),
        "desire": init_vae_block_params(k_desire, INPUT_DIM + LATENT_DIM, LATENT_DIM, HIDDEN_DIM),
        "intention": init_vae_block_params(k_intent, INPUT_DIM + LATENT_DIM, LATENT_DIM, HIDDEN_DIM),
    }

    outs = hierarchical_mind_state_vae_forward(
        x, all_params, k_eps, input_dim=INPUT_DIM, latent_dim=LATENT_DIM,
        hidden_dim=HIDDEN_DIM, ablation_mode="full")
    outs = jax.tree_util.tree_map(jax.block_until_ready, outs)

    # shape & finiteness sanity
    assert outs["z_belief"].shape == (B, LATENT_DIM)
    assert outs["recon_belief"].shape == (B, INPUT_DIM)
    assert outs["recon_desire"].shape == (B, INPUT_DIM + LATENT_DIM)
    assert outs["recon_intention"].shape == (B, INPUT_DIM + LATENT_DIM)
    for v in outs.values():
        assert bool(jnp.all(jnp.isfinite(v)))

    # numerical check vs. f32 reference (bf16 MXU inputs -> loose tolerance)
    eps = jax.random.normal(k_eps, (B, 3 * LATENT_DIM), jnp.float32)
    refs = _ref_forward(x, all_params, eps,
                        ["belief", "desire", "intention"], LATENT_DIM)
    for name in ["belief", "desire", "intention"]:
        z, mu, logvar, recon = refs[name]
        for got, want in [(outs[f"z_{name}"], z), (outs[f"mu_{name}"], mu),
                          (outs[f"logvar_{name}"], logvar),
                          (outs[f"recon_{name}"], recon)]:
            assert bool(jnp.allclose(got, want, rtol=0.1, atol=0.1)), name

    print("KERNEL_OK")
</pallas_src>

<mosaic_0001>
module attributes {stable_mosaic.version = 11 : i64} {
  func.func @_fused_hier_vae_kernel(%arg0: i32, %arg1: memref<2x16xf32, #tpu.memory_space<vmem>>, %arg2: memref<2x24xf32, #tpu.memory_space<vmem>>, %arg3: memref<3x24x32xbf16, #tpu.memory_space<vmem>>, %arg4: memref<3x32xf32, #tpu.memory_space<vmem>>, %arg5: memref<3x32x32xbf16, #tpu.memory_space<vmem>>, %arg6: memref<3x32xf32, #tpu.memory_space<vmem>>, %arg7: memref<3x32x16xbf16, #tpu.memory_space<vmem>>, %arg8: memref<3x16xf32, #tpu.memory_space<vmem>>, %arg9: memref<3x8x32xbf16, #tpu.memory_space<vmem>>, %arg10: memref<3x32xf32, #tpu.memory_space<vmem>>, %arg11: memref<3x32x24xbf16, #tpu.memory_space<vmem>>, %arg12: memref<3x24xf32, #tpu.memory_space<vmem>>, %arg13: memref<2x144xf32, #tpu.memory_space<vmem>>) attributes {dimension_semantics = [#tpu.dimension_semantics<parallel>], iteration_bounds = array<i64: 1>, scalar_prefetch = 0 : i64, scratch_operands = 0 : i64, tpu.core_type = #tpu.core_type<tc>, window_params = [{transform_indices = @transform_0, window_bounds = array<i64: 2, 16>}, {transform_indices = @transform_1, window_bounds = array<i64: 2, 24>}, {pipeline_mode = #tpu.pipeline_mode<synchronous>, transform_indices = @transform_2, window_bounds = array<i64: 3, 24, 32>}, {pipeline_mode = #tpu.pipeline_mode<synchronous>, transform_indices = @transform_3, window_bounds = array<i64: 3, 32>}, {pipeline_mode = #tpu.pipeline_mode<synchronous>, transform_indices = @transform_4, window_bounds = array<i64: 3, 32, 32>}, {pipeline_mode = #tpu.pipeline_mode<synchronous>, transform_indices = @transform_5, window_bounds = array<i64: 3, 32>}, {pipeline_mode = #tpu.pipeline_mode<synchronous>, transform_indices = @transform_6, window_bounds = array<i64: 3, 32, 16>}, {pipeline_mode = #tpu.pipeline_mode<synchronous>, transform_indices = @transform_7, window_bounds = array<i64: 3, 16>}, {pipeline_mode = #tpu.pipeline_mode<synchronous>, transform_indices = @transform_8, window_bounds = array<i64: 3, 8, 32>}, {pipeline_mode = #tpu.pipeline_mode<synchronous>, transform_indices = @transform_9, window_bounds = array<i64: 3, 32>}, {pipeline_mode = #tpu.pipeline_mode<synchronous>, transform_indices = @transform_10, window_bounds = array<i64: 3, 32, 24>}, {pipeline_mode = #tpu.pipeline_mode<synchronous>, transform_indices = @transform_11, window_bounds = array<i64: 3, 24>}, {transform_indices = @transform_12, window_bounds = array<i64: 2, 144>}]} {
    %c0 = arith.constant 0 : index
    %c0_0 = arith.constant 0 : index
    %0 = vector.load %arg1[%c0, %c0_0] : memref<2x16xf32, #tpu.memory_space<vmem>>, vector<2x16xf32>
    %1 = arith.truncf %0 : vector<2x16xf32> to vector<2x16xbf16>
    %c0_1 = arith.constant 0 : index
    %c0_2 = arith.constant 0 : index
    %c0_3 = arith.constant 0 : index
    %2 = vector.load %arg3[%c0_1, %c0_2, %c0_3] : memref<3x24x32xbf16, #tpu.memory_space<vmem>>, vector<1x16x32xbf16>
    %3 = vector.shape_cast %2 : vector<1x16x32xbf16> to vector<16x32xbf16>
    %cst = arith.constant dense<0.000000e+00> : vector<2x32xf32>
    %4 = tpu.matmul %1, %3, %cst {dimension_numbers = #tpu.dot_dimension_numbers<[1], [0], [0], [1], [0, 0, 1, 1], [], []>} : vector<2x16xbf16>, vector<16x32xbf16>, vector<2x32xf32> -> vector<2x32xf32>
    %c0_4 = arith.constant 0 : index
    %c0_5 = arith.constant 0 : index
    %5 = vector.load %arg4[%c0_4, %c0_5] : memref<3x32xf32, #tpu.memory_space<vmem>>, vector<1x32xf32>
    %6 = vector.broadcast %5 : vector<1x32xf32> to vector<2x32xf32>
    %7 = arith.addf %4, %6 : vector<2x32xf32>
    %cst_6 = arith.constant 0.000000e+00 : f32
    %8 = vector.broadcast %cst_6 : f32 to vector<2x32xf32>
    %9 = arith.maximumf %7, %8 : vector<2x32xf32>
    %10 = arith.truncf %9 : vector<2x32xf32> to vector<2x32xbf16>
    %c0_7 = arith.constant 0 : index
    %c0_8 = arith.constant 0 : index
    %c0_9 = arith.constant 0 : index
    %11 = vector.load %arg5[%c0_7, %c0_8, %c0_9] : memref<3x32x32xbf16, #tpu.memory_space<vmem>>, vector<1x32x32xbf16>
    %12 = vector.shape_cast %11 : vector<1x32x32xbf16> to vector<32x32xbf16>
    %cst_10 = arith.constant dense<0.000000e+00> : vector<2x32xf32>
    %13 = tpu.matmul %10, %12, %cst_10 {dimension_numbers = #tpu.dot_dimension_numbers<[1], [0], [0], [1], [0, 0, 1, 1], [], []>} : vector<2x32xbf16>, vector<32x32xbf16>, vector<2x32xf32> -> vector<2x32xf32>
    %c0_11 = arith.constant 0 : index
    %c0_12 = arith.constant 0 : index
    %14 = vector.load %arg6[%c0_11, %c0_12] : memref<3x32xf32, #tpu.memory_space<vmem>>, vector<1x32xf32>
    %15 = vector.broadcast %14 : vector<1x32xf32> to vector<2x32xf32>
    %16 = arith.addf %13, %15 : vector<2x32xf32>
    %cst_13 = arith.constant 0.000000e+00 : f32
    %17 = vector.broadcast %cst_13 : f32 to vector<2x32xf32>
    %18 = arith.maximumf %16, %17 : vector<2x32xf32>
    %19 = arith.truncf %18 : vector<2x32xf32> to vector<2x32xbf16>
    %c0_14 = arith.constant 0 : index
    %c0_15 = arith.constant 0 : index
    %c0_16 = arith.constant 0 : index
    %20 = vector.load %arg7[%c0_14, %c0_15, %c0_16] : memref<3x32x16xbf16, #tpu.memory_space<vmem>>, vector<1x32x16xbf16>
    %21 = vector.shape_cast %20 : vector<1x32x16xbf16> to vector<32x16xbf16>
    %cst_17 = arith.constant dense<0.000000e+00> : vector<2x16xf32>
    %22 = tpu.matmul %19, %21, %cst_17 {dimension_numbers = #tpu.dot_dimension_numbers<[1], [0], [0], [1], [0, 0, 1, 1], [], []>} : vector<2x32xbf16>, vector<32x16xbf16>, vector<2x16xf32> -> vector<2x16xf32>
    %c0_18 = arith.constant 0 : index
    %c0_19 = arith.constant 0 : index
    %23 = vector.load %arg8[%c0_18, %c0_19] : memref<3x16xf32, #tpu.memory_space<vmem>>, vector<1x16xf32>
    %24 = vector.broadcast %23 : vector<1x16xf32> to vector<2x16xf32>
    %25 = arith.addf %22, %24 : vector<2x16xf32>
    %26 = vector.extract_strided_slice %25 {offsets = [0, 0], sizes = [2, 8], strides = [1, 1]} : vector<2x16xf32> to vector<2x8xf32>
    %27 = vector.extract_strided_slice %25 {offsets = [0, 8], sizes = [2, 8], strides = [1, 1]} : vector<2x16xf32> to vector<2x8xf32>
    %c0_20 = arith.constant 0 : index
    %c0_21 = arith.constant 0 : index
    %28 = vector.load %arg2[%c0_20, %c0_21] : memref<2x24xf32, #tpu.memory_space<vmem>>, vector<2x8xf32>
    %cst_22 = arith.constant 5.000000e-01 : f32
    %29 = vector.broadcast %cst_22 : f32 to vector<2x8xf32>
    %30 = arith.mulf %29, %27 : vector<2x8xf32>
    %31 = math.exp %30 : vector<2x8xf32>
    %32 = arith.mulf %28, %31 : vector<2x8xf32>
    %33 = arith.addf %26, %32 : vector<2x8xf32>
    %34 = arith.truncf %33 : vector<2x8xf32> to vector<2x8xbf16>
    %c0_23 = arith.constant 0 : index
    %c0_24 = arith.constant 0 : index
    %c0_25 = arith.constant 0 : index
    %35 = vector.load %arg9[%c0_23, %c0_24, %c0_25] : memref<3x8x32xbf16, #tpu.memory_space<vmem>>, vector<1x8x32xbf16>
    %36 = vector.shape_cast %35 : vector<1x8x32xbf16> to vector<8x32xbf16>
    %cst_26 = arith.constant dense<0.000000e+00> : vector<2x32xf32>
    %37 = tpu.matmul %34, %36, %cst_26 {dimension_numbers = #tpu.dot_dimension_numbers<[1], [0], [0], [1], [0, 0, 1, 1], [], []>} : vector<2x8xbf16>, vector<8x32xbf16>, vector<2x32xf32> -> vector<2x32xf32>
    %c0_27 = arith.constant 0 : index
    %c0_28 = arith.constant 0 : index
    %38 = vector.load %arg10[%c0_27, %c0_28] : memref<3x32xf32, #tpu.memory_space<vmem>>, vector<1x32xf32>
    %39 = vector.broadcast %38 : vector<1x32xf32> to vector<2x32xf32>
    %40 = arith.addf %37, %39 : vector<2x32xf32>
    %cst_29 = arith.constant 0.000000e+00 : f32
    %41 = vector.broadcast %cst_29 : f32 to vector<2x32xf32>
    %42 = arith.maximumf %40, %41 : vector<2x32xf32>
    %43 = arith.truncf %42 : vector<2x32xf32> to vector<2x32xbf16>
    %c0_30 = arith.constant 0 : index
    %c0_31 = arith.constant 0 : index
    %c0_32 = arith.constant 0 : index
    %44 = vector.load %arg11[%c0_30, %c0_31, %c0_32] : memref<3x32x24xbf16, #tpu.memory_space<vmem>>, vector<1x32x24xbf16>
    %45 = vector.shape_cast %44 : vector<1x32x24xbf16> to vector<32x24xbf16>
    %cst_33 = arith.constant dense<0.000000e+00> : vector<2x24xf32>
    %46 = tpu.matmul %43, %45, %cst_33 {dimension_numbers = #tpu.dot_dimension_numbers<[1], [0], [0], [1], [0, 0, 1, 1], [], []>} : vector<2x32xbf16>, vector<32x24xbf16>, vector<2x24xf32> -> vector<2x24xf32>
    %c0_34 = arith.constant 0 : index
    %c0_35 = arith.constant 0 : index
    %47 = vector.load %arg12[%c0_34, %c0_35] : memref<3x24xf32, #tpu.memory_space<vmem>>, vector<1x24xf32>
    %48 = vector.broadcast %47 : vector<1x24xf32> to vector<2x24xf32>
    %49 = arith.addf %46, %48 : vector<2x24xf32>
    %c1 = arith.constant 1 : index
    %c0_36 = arith.constant 0 : index
    %c0_37 = arith.constant 0 : index
    %50 = vector.load %arg3[%c1, %c0_36, %c0_37] : memref<3x24x32xbf16, #tpu.memory_space<vmem>>, vector<1x16x32xbf16>
    %51 = vector.shape_cast %50 : vector<1x16x32xbf16> to vector<16x32xbf16>
    %cst_38 = arith.constant dense<0.000000e+00> : vector<2x32xf32>
    %52 = tpu.matmul %1, %51, %cst_38 {dimension_numbers = #tpu.dot_dimension_numbers<[1], [0], [0], [1], [0, 0, 1, 1], [], []>} : vector<2x16xbf16>, vector<16x32xbf16>, vector<2x32xf32> -> vector<2x32xf32>
    %c1_39 = arith.constant 1 : index
    %c16 = arith.constant 16 : index
    %c0_40 = arith.constant 0 : index
    %53 = vector.load %arg3[%c1_39, %c16, %c0_40] : memref<3x24x32xbf16, #tpu.memory_space<vmem>>, vector<1x8x32xbf16>
    %54 = vector.shape_cast %53 : vector<1x8x32xbf16> to vector<8x32xbf16>
    %cst_41 = arith.constant dense<0.000000e+00> : vector<2x32xf32>
    %55 = tpu.matmul %34, %54, %cst_41 {dimension_numbers = #tpu.dot_dimension_numbers<[1], [0], [0], [1], [0, 0, 1, 1], [], []>} : vector<2x8xbf16>, vector<8x32xbf16>, vector<2x32xf32> -> vector<2x32xf32>
    %56 = arith.addf %52, %55 : vector<2x32xf32>
    %c1_42 = arith.constant 1 : index
    %c0_43 = arith.constant 0 : index
    %57 = vector.load %arg4[%c1_42, %c0_43] : memref<3x32xf32, #tpu.memory_space<vmem>>, vector<1x32xf32>
    %58 = vector.broadcast %57 : vector<1x32xf32> to vector<2x32xf32>
    %59 = arith.addf %56, %58 : vector<2x32xf32>
    %cst_44 = arith.constant 0.000000e+00 : f32
    %60 = vector.broadcast %cst_44 : f32 to vector<2x32xf32>
    %61 = arith.maximumf %59, %60 : vector<2x32xf32>
    %62 = arith.truncf %61 : vector<2x32xf32> to vector<2x32xbf16>
    %c1_45 = arith.constant 1 : index
    %c0_46 = arith.constant 0 : index
    %c0_47 = arith.constant 0 : index
    %63 = vector.load %arg5[%c1_45, %c0_46, %c0_47] : memref<3x32x32xbf16, #tpu.memory_space<vmem>>, vector<1x32x32xbf16>
    %64 = vector.shape_cast %63 : vector<1x32x32xbf16> to vector<32x32xbf16>
    %cst_48 = arith.constant dense<0.000000e+00> : vector<2x32xf32>
    %65 = tpu.matmul %62, %64, %cst_48 {dimension_numbers = #tpu.dot_dimension_numbers<[1], [0], [0], [1], [0, 0, 1, 1], [], []>} : vector<2x32xbf16>, vector<32x32xbf16>, vector<2x32xf32> -> vector<2x32xf32>
    %c1_49 = arith.constant 1 : index
    %c0_50 = arith.constant 0 : index
    %66 = vector.load %arg6[%c1_49, %c0_50] : memref<3x32xf32, #tpu.memory_space<vmem>>, vector<1x32xf32>
    %67 = vector.broadcast %66 : vector<1x32xf32> to vector<2x32xf32>
    %68 = arith.addf %65, %67 : vector<2x32xf32>
    %cst_51 = arith.constant 0.000000e+00 : f32
    %69 = vector.broadcast %cst_51 : f32 to vector<2x32xf32>
    %70 = arith.maximumf %68, %69 : vector<2x32xf32>
    %71 = arith.truncf %70 : vector<2x32xf32> to vector<2x32xbf16>
    %c1_52 = arith.constant 1 : index
    %c0_53 = arith.constant 0 : index
    %c0_54 = arith.constant 0 : index
    %72 = vector.load %arg7[%c1_52, %c0_53, %c0_54] : memref<3x32x16xbf16, #tpu.memory_space<vmem>>, vector<1x32x16xbf16>
    %73 = vector.shape_cast %72 : vector<1x32x16xbf16> to vector<32x16xbf16>
    %cst_55 = arith.constant dense<0.000000e+00> : vector<2x16xf32>
    %74 = tpu.matmul %71, %73, %cst_55 {dimension_numbers = #tpu.dot_dimension_numbers<[1], [0], [0], [1], [0, 0, 1, 1], [], []>} : vector<2x32xbf16>, vector<32x16xbf16>, vector<2x16xf32> -> vector<2x16xf32>
    %c1_56 = arith.constant 1 : index
    %c0_57 = arith.constant 0 : index
    %75 = vector.load %arg8[%c1_56, %c0_57] : memref<3x16xf32, #tpu.memory_space<vmem>>, vector<1x16xf32>
    %76 = vector.broadcast %75 : vector<1x16xf32> to vector<2x16xf32>
    %77 = arith.addf %74, %76 : vector<2x16xf32>
    %78 = vector.extract_strided_slice %77 {offsets = [0, 0], sizes = [2, 8], strides = [1, 1]} : vector<2x16xf32> to vector<2x8xf32>
    %79 = vector.extract_strided_slice %77 {offsets = [0, 8], sizes = [2, 8], strides = [1, 1]} : vector<2x16xf32> to vector<2x8xf32>
    %c0_58 = arith.constant 0 : index
    %c8 = arith.constant 8 : index
    %80 = vector.load %arg2[%c0_58, %c8] : memref<2x24xf32, #tpu.memory_space<vmem>>, vector<2x8xf32>
    %cst_59 = arith.constant 5.000000e-01 : f32
    %81 = vector.broadcast %cst_59 : f32 to vector<2x8xf32>
    %82 = arith.mulf %81, %79 : vector<2x8xf32>
    %83 = math.exp %82 : vector<2x8xf32>
    %84 = arith.mulf %80, %83 : vector<2x8xf32>
    %85 = arith.addf %78, %84 : vector<2x8xf32>
    %86 = arith.truncf %85 : vector<2x8xf32> to vector<2x8xbf16>
    %c1_60 = arith.constant 1 : index
    %c0_61 = arith.constant 0 : index
    %c0_62 = arith.constant 0 : index
    %87 = vector.load %arg9[%c1_60, %c0_61, %c0_62] : memref<3x8x32xbf16, #tpu.memory_space<vmem>>, vector<1x8x32xbf16>
    %88 = vector.shape_cast %87 : vector<1x8x32xbf16> to vector<8x32xbf16>
    %cst_63 = arith.constant dense<0.000000e+00> : vector<2x32xf32>
    %89 = tpu.matmul %86, %88, %cst_63 {dimension_numbers = #tpu.dot_dimension_numbers<[1], [0], [0], [1], [0, 0, 1, 1], [], []>} : vector<2x8xbf16>, vector<8x32xbf16>, vector<2x32xf32> -> vector<2x32xf32>
    %c1_64 = arith.constant 1 : index
    %c0_65 = arith.constant 0 : index
    %90 = vector.load %arg10[%c1_64, %c0_65] : memref<3x32xf32, #tpu.memory_space<vmem>>, vector<1x32xf32>
    %91 = vector.broadcast %90 : vector<1x32xf32> to vector<2x32xf32>
    %92 = arith.addf %89, %91 : vector<2x32xf32>
    %cst_66 = arith.constant 0.000000e+00 : f32
    %93 = vector.broadcast %cst_66 : f32 to vector<2x32xf32>
    %94 = arith.maximumf %92, %93 : vector<2x32xf32>
    %95 = arith.truncf %94 : vector<2x32xf32> to vector<2x32xbf16>
    %c1_67 = arith.constant 1 : index
    %c0_68 = arith.constant 0 : index
    %c0_69 = arith.constant 0 : index
    %96 = vector.load %arg11[%c1_67, %c0_68, %c0_69] : memref<3x32x24xbf16, #tpu.memory_space<vmem>>, vector<1x32x24xbf16>
    %97 = vector.shape_cast %96 : vector<1x32x24xbf16> to vector<32x24xbf16>
    %cst_70 = arith.constant dense<0.000000e+00> : vector<2x24xf32>
    %98 = tpu.matmul %95, %97, %cst_70 {dimension_numbers = #tpu.dot_dimension_numbers<[1], [0], [0], [1], [0, 0, 1, 1], [], []>} : vector<2x32xbf16>, vector<32x24xbf16>, vector<2x24xf32> -> vector<2x24xf32>
    %c1_71 = arith.constant 1 : index
    %c0_72 = arith.constant 0 : index
    %99 = vector.load %arg12[%c1_71, %c0_72] : memref<3x24xf32, #tpu.memory_space<vmem>>, vector<1x24xf32>
    %100 = vector.broadcast %99 : vector<1x24xf32> to vector<2x24xf32>
    %101 = arith.addf %98, %100 : vector<2x24xf32>
    %c2 = arith.constant 2 : index
    %c0_73 = arith.constant 0 : index
    %c0_74 = arith.constant 0 : index
    %102 = vector.load %arg3[%c2, %c0_73, %c0_74] : memref<3x24x32xbf16, #tpu.memory_space<vmem>>, vector<1x16x32xbf16>
    %103 = vector.shape_cast %102 : vector<1x16x32xbf16> to vector<16x32xbf16>
    %cst_75 = arith.constant dense<0.000000e+00> : vector<2x32xf32>
    %104 = tpu.matmul %1, %103, %cst_75 {dimension_numbers = #tpu.dot_dimension_numbers<[1], [0], [0], [1], [0, 0, 1, 1], [], []>} : vector<2x16xbf16>, vector<16x32xbf16>, vector<2x32xf32> -> vector<2x32xf32>
    %c2_76 = arith.constant 2 : index
    %c16_77 = arith.constant 16 : index
    %c0_78 = arith.constant 0 : index
    %105 = vector.load %arg3[%c2_76, %c16_77, %c0_78] : memref<3x24x32xbf16, #tpu.memory_space<vmem>>, vector<1x8x32xbf16>
    %106 = vector.shape_cast %105 : vector<1x8x32xbf16> to vector<8x32xbf16>
    %cst_79 = arith.constant dense<0.000000e+00> : vector<2x32xf32>
    %107 = tpu.matmul %86, %106, %cst_79 {dimension_numbers = #tpu.dot_dimension_numbers<[1], [0], [0], [1], [0, 0, 1, 1], [], []>} : vector<2x8xbf16>, vector<8x32xbf16>, vector<2x32xf32> -> vector<2x32xf32>
    %108 = arith.addf %104, %107 : vector<2x32xf32>
    %c2_80 = arith.constant 2 : index
    %c0_81 = arith.constant 0 : index
    %109 = vector.load %arg4[%c2_80, %c0_81] : memref<3x32xf32, #tpu.memory_space<vmem>>, vector<1x32xf32>
    %110 = vector.broadcast %109 : vector<1x32xf32> to vector<2x32xf32>
    %111 = arith.addf %108, %110 : vector<2x32xf32>
    %cst_82 = arith.constant 0.000000e+00 : f32
    %112 = vector.broadcast %cst_82 : f32 to vector<2x32xf32>
    %113 = arith.maximumf %111, %112 : vector<2x32xf32>
    %114 = arith.truncf %113 : vector<2x32xf32> to vector<2x32xbf16>
    %c2_83 = arith.constant 2 : index
    %c0_84 = arith.constant 0 : index
    %c0_85 = arith.constant 0 : index
    %115 = vector.load %arg5[%c2_83, %c0_84, %c0_85] : memref<3x32x32xbf16, #tpu.memory_space<vmem>>, vector<1x32x32xbf16>
    %116 = vector.shape_cast %115 : vector<1x32x32xbf16> to vector<32x32xbf16>
    %cst_86 = arith.constant dense<0.000000e+00> : vector<2x32xf32>
    %117 = tpu.matmul %114, %116, %cst_86 {dimension_numbers = #tpu.dot_dimension_numbers<[1], [0], [0], [1], [0, 0, 1, 1], [], []>} : vector<2x32xbf16>, vector<32x32xbf16>, vector<2x32xf32> -> vector<2x32xf32>
    %c2_87 = arith.constant 2 : index
    %c0_88 = arith.constant 0 : index
    %118 = vector.load %arg6[%c2_87, %c0_88] : memref<3x32xf32, #tpu.memory_space<vmem>>, vector<1x32xf32>
    %119 = vector.broadcast %118 : vector<1x32xf32> to vector<2x32xf32>
    %120 = arith.addf %117, %119 : vector<2x32xf32>
    %cst_89 = arith.constant 0.000000e+00 : f32
    %121 = vector.broadcast %cst_89 : f32 to vector<2x32xf32>
    %122 = arith.maximumf %120, %121 : vector<2x32xf32>
    %123 = arith.truncf %122 : vector<2x32xf32> to vector<2x32xbf16>
    %c2_90 = arith.constant 2 : index
    %c0_91 = arith.constant 0 : index
    %c0_92 = arith.constant 0 : index
    %124 = vector.load %arg7[%c2_90, %c0_91, %c0_92] : memref<3x32x16xbf16, #tpu.memory_space<vmem>>, vector<1x32x16xbf16>
    %125 = vector.shape_cast %124 : vector<1x32x16xbf16> to vector<32x16xbf16>
    %cst_93 = arith.constant dense<0.000000e+00> : vector<2x16xf32>
    %126 = tpu.matmul %123, %125, %cst_93 {dimension_numbers = #tpu.dot_dimension_numbers<[1], [0], [0], [1], [0, 0, 1, 1], [], []>} : vector<2x32xbf16>, vector<32x16xbf16>, vector<2x16xf32> -> vector<2x16xf32>
    %c2_94 = arith.constant 2 : index
    %c0_95 = arith.constant 0 : index
    %127 = vector.load %arg8[%c2_94, %c0_95] : memref<3x16xf32, #tpu.memory_space<vmem>>, vector<1x16xf32>
    %128 = vector.broadcast %127 : vector<1x16xf32> to vector<2x16xf32>
    %129 = arith.addf %126, %128 : vector<2x16xf32>
    %130 = vector.extract_strided_slice %129 {offsets = [0, 0], sizes = [2, 8], strides = [1, 1]} : vector<2x16xf32> to vector<2x8xf32>
    %131 = vector.extract_strided_slice %129 {offsets = [0, 8], sizes = [2, 8], strides = [1, 1]} : vector<2x16xf32> to vector<2x8xf32>
    %c0_96 = arith.constant 0 : index
    %c16_97 = arith.constant 16 : index
    %132 = vector.load %arg2[%c0_96, %c16_97] : memref<2x24xf32, #tpu.memory_space<vmem>>, vector<2x8xf32>
    %cst_98 = arith.constant 5.000000e-01 : f32
    %133 = vector.broadcast %cst_98 : f32 to vector<2x8xf32>
    %134 = arith.mulf %133, %131 : vector<2x8xf32>
    %135 = math.exp %134 : vector<2x8xf32>
    %136 = arith.mulf %132, %135 : vector<2x8xf32>
    %137 = arith.addf %130, %136 : vector<2x8xf32>
    %138 = arith.truncf %137 : vector<2x8xf32> to vector<2x8xbf16>
    %c2_99 = arith.constant 2 : index
    %c0_100 = arith.constant 0 : index
    %c0_101 = arith.constant 0 : index
    %139 = vector.load %arg9[%c2_99, %c0_100, %c0_101] : memref<3x8x32xbf16, #tpu.memory_space<vmem>>, vector<1x8x32xbf16>
    %140 = vector.shape_cast %139 : vector<1x8x32xbf16> to vector<8x32xbf16>
    %cst_102 = arith.constant dense<0.000000e+00> : vector<2x32xf32>
    %141 = tpu.matmul %138, %140, %cst_102 {dimension_numbers = #tpu.dot_dimension_numbers<[1], [0], [0], [1], [0, 0, 1, 1], [], []>} : vector<2x8xbf16>, vector<8x32xbf16>, vector<2x32xf32> -> vector<2x32xf32>
    %c2_103 = arith.constant 2 : index
    %c0_104 = arith.constant 0 : index
    %142 = vector.load %arg10[%c2_103, %c0_104] : memref<3x32xf32, #tpu.memory_space<vmem>>, vector<1x32xf32>
    %143 = vector.broadcast %142 : vector<1x32xf32> to vector<2x32xf32>
    %144 = arith.addf %141, %143 : vector<2x32xf32>
    %cst_105 = arith.constant 0.000000e+00 : f32
    %145 = vector.broadcast %cst_105 : f32 to vector<2x32xf32>
    %146 = arith.maximumf %144, %145 : vector<2x32xf32>
    %147 = arith.truncf %146 : vector<2x32xf32> to vector<2x32xbf16>
    %c2_106 = arith.constant 2 : index
    %c0_107 = arith.constant 0 : index
    %c0_108 = arith.constant 0 : index
    %148 = vector.load %arg11[%c2_106, %c0_107, %c0_108] : memref<3x32x24xbf16, #tpu.memory_space<vmem>>, vector<1x32x24xbf16>
    %149 = vector.shape_cast %148 : vector<1x32x24xbf16> to vector<32x24xbf16>
    %cst_109 = arith.constant dense<0.000000e+00> : vector<2x24xf32>
    %150 = tpu.matmul %147, %149, %cst_109 {dimension_numbers = #tpu.dot_dimension_numbers<[1], [0], [0], [1], [0, 0, 1, 1], [], []>} : vector<2x32xbf16>, vector<32x24xbf16>, vector<2x24xf32> -> vector<2x24xf32>
    %c2_110 = arith.constant 2 : index
    %c0_111 = arith.constant 0 : index
    %151 = vector.load %arg12[%c2_110, %c0_111] : memref<3x24xf32, #tpu.memory_space<vmem>>, vector<1x24xf32>
    %152 = vector.broadcast %151 : vector<1x24xf32> to vector<2x24xf32>
    %153 = arith.addf %150, %152 : vector<2x24xf32>
    %154 = tpu.concatenate %33, %26, %27, %49, %85, %78, %79, %101, %137, %130, %131, %153 in 1 : vector<2x8xf32>, vector<2x8xf32>, vector<2x8xf32>, vector<2x24xf32>, vector<2x8xf32>, vector<2x8xf32>, vector<2x8xf32>, vector<2x24xf32>, vector<2x8xf32>, vector<2x8xf32>, vector<2x8xf32>, vector<2x24xf32> -> vector<2x144xf32>
    %c0_112 = arith.constant 0 : index
    %c0_113 = arith.constant 0 : index
    %155 = vector.load %arg13[%c0_112, %c0_113] : memref<2x144xf32, #tpu.memory_space<vmem>>, vector<2x144xf32>
    tpu.vector_store %arg13[%c0_112, %c0_113], %154 {strides = array<i32>} : memref<2x144xf32, #tpu.memory_space<vmem>>, vector<2x144xf32>,
    return
  }
  func.func @transform_0(%arg0: i32) -> (i32, i32) {
    %c0_i32 = arith.constant 0 : i32
    %c0_i32_0 = arith.constant 0 : i32
    return %arg0, %c0_i32 : i32, i32
  }
  func.func @transform_1(%arg0: i32) -> (i32, i32) {
    %c0_i32 = arith.constant 0 : i32
    %c0_i32_0 = arith.constant 0 : i32
    return %arg0, %c0_i32 : i32, i32
  }
  func.func @transform_2(%arg0: i32) -> (i32, i32, i32) {
    %c0_i32 = arith.constant 0 : i32
    %c0_i32_0 = arith.constant 0 : i32
    %c0_i32_1 = arith.constant 0 : i32
    %c0_i32_2 = arith.constant 0 : i32
    return %c0_i32, %c0_i32_0, %c0_i32_1 : i32, i32, i32
  }
  func.func @transform_3(%arg0: i32) -> (i32, i32) {
    %c0_i32 = arith.constant 0 : i32
    %c0_i32_0 = arith.constant 0 : i32
    %c0_i32_1 = arith.constant 0 : i32
    return %c0_i32, %c0_i32_0 : i32, i32
  }
  func.func @transform_4(%arg0: i32) -> (i32, i32, i32) {
    %c0_i32 = arith.constant 0 : i32
    %c0_i32_0 = arith.constant 0 : i32
    %c0_i32_1 = arith.constant 0 : i32
    %c0_i32_2 = arith.constant 0 : i32
    return %c0_i32, %c0_i32_0, %c0_i32_1 : i32, i32, i32
  }
  func.func @transform_5(%arg0: i32) -> (i32, i32) {
    %c0_i32 = arith.constant 0 : i32
    %c0_i32_0 = arith.constant 0 : i32
    %c0_i32_1 = arith.constant 0 : i32
    return %c0_i32, %c0_i32_0 : i32, i32
  }
  func.func @transform_6(%arg0: i32) -> (i32, i32, i32) {
    %c0_i32 = arith.constant 0 : i32
    %c0_i32_0 = arith.constant 0 : i32
    %c0_i32_1 = arith.constant 0 : i32
    %c0_i32_2 = arith.constant 0 : i32
    return %c0_i32, %c0_i32_0, %c0_i32_1 : i32, i32, i32
  }
  func.func @transform_7(%arg0: i32) -> (i32, i32) {
    %c0_i32 = arith.constant 0 : i32
    %c0_i32_0 = arith.constant 0 : i32
    %c0_i32_1 = arith.constant 0 : i32
    return %c0_i32, %c0_i32_0 : i32, i32
  }
  func.func @transform_8(%arg0: i32) -> (i32, i32, i32) {
    %c0_i32 = arith.constant 0 : i32
    %c0_i32_0 = arith.constant 0 : i32
    %c0_i32_1 = arith.constant 0 : i32
    %c0_i32_2 = arith.constant 0 : i32
    return %c0_i32, %c0_i32_0, %c0_i32_1 : i32, i32, i32
  }
  func.func @transform_9(%arg0: i32) -> (i32, i32) {
    %c0_i32 = arith.constant 0 : i32
    %c0_i32_0 = arith.constant 0 : i32
    %c0_i32_1 = arith.constant 0 : i32
    return %c0_i32, %c0_i32_0 : i32, i32
  }
  func.func @transform_10(%arg0: i32) -> (i32, i32, i32) {
    %c0_i32 = arith.constant 0 : i32
    %c0_i32_0 = arith.constant 0 : i32
    %c0_i32_1 = arith.constant 0 : i32
    %c0_i32_2 = arith.constant 0 : i32
    return %c0_i32, %c0_i32_0, %c0_i32_1 : i32, i32, i32
  }
  func.func @transform_11(%arg0: i32) -> (i32, i32) {
    %c0_i32 = arith.constant 0 : i32
    %c0_i32_0 = arith.constant 0 : i32
    %c0_i32_1 = arith.constant 0 : i32
    return %c0_i32, %c0_i32_0 : i32, i32
  }
  func.func @transform_12(%arg0: i32) -> (i32, i32) {
    %c0_i32 = arith.constant 0 : i32
    %c0_i32_0 = arith.constant 0 : i32
    return %arg0, %c0_i32 : i32, i32
  }
}

</mosaic_0001>

<bundles_post_ra>
// kernel: tpu_custom_call.1
= control target key start
LH: loop header
LB: loop body
LE: loop exit
PB: predicated region body
PF: predicated region fallthrough
CT: control target
= control target key end

     0   :  { %vm55_vm0 = vcmask 130048   ;;  %s1135_s0 = inlined_call_operand.vmem [shape: f32[2,16], index: 0, kind: input, shape index: {}]   ;;  %s1136_s1 = inlined_call_operand.vmem [shape: f32[2,24], index: 1, kind: input, shape index: {}]   ;;  %s1137_s2 = inlined_call_operand.vmem [shape: bf16[3,24,32], index: 2, kind: input, shape index: {}]   ;;  %s1138_s3 = inlined_call_operand.vmem [shape: f32[3,32], index: 3, kind: input, shape index: {}]   ;;  %s1139_s4 = inlined_call_operand.vmem [shape: bf16[3,32,32], index: 4, kind: input, shape index: {}]   ;;  %s1140_s5 = inlined_call_operand.vmem [shape: f32[3,32], index: 5, kind: input, shape index: {}]   ;;  %s1141_s6 = inlined_call_operand.vmem [shape: bf16[3,32,16], index: 6, kind: input, shape index: {}]   ;;  %s1142_s7 = inlined_call_operand.vmem [shape: f32[3,16], index: 7, kind: input, shape index: {}]   ;;  %s1143_s8 = inlined_call_operand.vmem [shape: bf16[3,8,32], index: 8, kind: input, shape index: {}]   ;;  %s1144_s9 = inlined_call_operand.vmem [shape: f32[3,32], index: 9, kind: input, shape index: {}]   ;;  %s1145_s10 = inlined_call_operand.vmem [shape: bf16[3,32,24], index: 10, kind: input, shape index: {}]   ;;  %s1146_s11 = inlined_call_operand.vmem [shape: f32[3,24], index: 11, kind: input, shape index: {}]   ;;  %s1147_s12 = inlined_call_operand.hbm [shape: f32[2,144], index: 12, kind: output, shape index: {}]  }
   0x1   :  { %v801_v0 = vld [vmem:[%s1137_s2] sm:$0xff] }
   0x2   :  { %v43_v1 = vld [vmem:[%s1135_s0] sm:$0x3]  ;;  %66 = vmatpush.bf16.msra.mxu0 %v801_v0 }
   0x3   :  { %v960_v2 = vpack.c.bf16 %v43_v1, %v43_v1 }
   0x5   :  { %672 = vmatmul.msk.bf16.vlgmr.msra.gmra.mxu0 %vm55_vm0, %v960_v2 }
   0x6   :  { %17 = vsyncpa [#allocation3], 0  ;;  %v803_v3 = vld [vmem:[%s1139_s4 + $0x8] sm:$0xff]  ;;  %v802_v4 = vld [vmem:[%s1139_s4] sm:$0xff]  ;;  %vm92_vm1 = vcmask 261120   ;;  %s879_s20 = smov 8  }
   0x7   :  { %102 = vmatpush.bf16.msra.mxu1 %v803_v3  ;;  %v832_v5 = vld [vmem:[%s1138_s3] ss:$0 sm:$0xff]  ;;  %v805_v11 = vld [vmem:[%s1141_s6 + $0x8] sm:$0xff]  ;;  %s880_s21 = smov 120   ;;  %vm163_vm2 = vcmask 1043456   ;;  %vm159_vm3 = vcmask 64512  }
   0x8   :  { %138 = vmatpush.bf16.msra.mxu2 %v805_v11  ;;  %v804_v12 = vld [vmem:[%s1141_s6] sm:$0xff]  ;;  %v703_v28 = vld [vmem:[%s1137_s2 + $0x14] sm:$0xf]  ;;  %v808_v29 = vld [vmem:[%s1137_s2 + $0xc] sm:$0xff]  ;;  %s881_s0 = smov 24   ;;  %s882_s22 = smov 48  }
   0x9   :  { %v833_v13 = vld [vmem:[%s1140_s5] ss:$0 sm:$0xff]  ;;  %v221_v30 = vsel %vm163_vm2, %v703_v28, 0  ;;  %v807_v36 = vld [vmem:[%s1145_s10 + $0x8] sm:$0xff]  ;;  %v810_v39 = vld [vmem:[%s1139_s4 + $0x18] sm:$0xff]  ;;  %s885_s25 = smov 56  }
   0xa   :  { %v834_v19 = vld [vmem:[%s1142_s7] ss:$0 sm:$0xff]  ;;  %209 = vmatpush.bf16.msrb.mxu0 %v807_v36  ;;  %v809_v41 = vld [vmem:[%s1139_s4 + $0x10] sm:$0xff]  ;;  %v836_v48 = vld [vmem:[%s1138_s3 + $0x1] ss:$0 sm:$0xff]  ;;  %s886_s26 = smov 104  }
   0xb   :  { %103 = vmatpush.bf16.msra.mxu1 %v802_v4  ;;  %v156_v26 = vld [vmem:[%s1143_s8] sm:$0xf]  ;;  %v812_v55 = vld [vmem:[%s1141_s6 + $0x18] sm:$0xff]  ;;  %v811_v56 = vld [vmem:[%s1141_s6 + $0x10] sm:$0xff]  ;;  %vm626_vm4 = vcmask 195584   ;;  %vm628_vm5 = vcmask 392192  }
   0xc   :  { %139 = vmatpush.bf16.msra.mxu2 %v804_v12  ;;  %v165_v27 = vsel %vm163_vm2, %v156_v26, 0  ;;  %v1005_v31 = vld [vmem:[%s1136_s1] sm:$0x3]  ;;  %vm630_vm6 = vcmask 457728   ;;  %vm632_vm7 = vcmask 523264   ;;  %vm634_vm8 = vcmask 588800  }
   0xd   :  { %174 = vmatpush.bf16.msra.mxu3 %v165_v27  ;;  %v806_v37 = vld [vmem:[%s1145_s10] sm:$0xff]  ;;  %vm636_vm9 = vcmask 785408   ;;  %vm638_vm10 = vcmask 850944   ;;  %vm640_vm11 = vcmask 916480   ;;  %vm642_vm12 = vcmask 982016   ;;  %s659_s14 = sshll.u32 %s1147_s12, 4  ;;  %s660_s14 = int_to_ptr.hbm [resolvable:$true] %s659_s14 }
   0xe   :  { %210 = vmatpush.bf16.msrb.mxu0 %v806_v37  ;;  %v835_v42 = vld [vmem:[%s1144_s9] ss:$0 sm:$0xff]  ;;  %v838_v61 = vld [vmem:[%s1140_s5 + $0x1] ss:$0 sm:$0xff]  ;;  %v841_v27 = vld [vmem:[%s1138_s3 + $0x2] ss:$0 sm:$0xff] }
   0xf   :  { %249 = vmatpush.bf16.msrb.mxu1 %v808_v29  ;;  %v837_v57 = vld [vmem:[%s1146_s11] ss:$0 sm:$0xff]  ;;  %v840_v26 = vld [vmem:[%s1144_s9 + $0x1] ss:$0 sm:$0xff]  ;;  %vm646_vm13 = vcmask 1041408   ;;  %vm649_vm14 = vcmask 125954  }
  0x10   :  { %288 = vmatpush.bf16.msrb.mxu2 %v810_v39  ;;  %v753_v4 = vld [vmem:[%s1137_s2 + $0x20] sm:$0xf]  ;;  %vm650_vm15 = vmor %vm649_vm14, %vm646_vm13 }
  0x11   :  { %230 = vmatpush.bf16.msrb.mxu3 %v221_v30 }
  0x12   :  { %325 = vmatpush.bf16.msra.mxu0 %v812_v55 }
  0x14   :  { %289 = vmatpush.bf16.msrb.mxu2 %v809_v41  ;;  %v818_v41 = vld [vmem:[%s1141_s6 + $0x20] sm:$0xff] }
  0x16   :  { %326 = vmatpush.bf16.msra.mxu0 %v811_v56 }
  0x82   :  { %v68_v6 = vpop.f32.mrf.mxu0 }
  0x83   :  { %v69_v7 = vadd.f32 %v832_v5, %v68_v6  ;;  %v815_v5 = vld [vmem:[%s1137_s2 + $0x18] sm:$0xff]  ;;  %v407_v6 = vsel %vm163_vm2, %v753_v4, 0  ;;  %s883_s2 = smov 72   ;;  %v845_v4 = vld [vmem:[%s1144_s9 + $0x2] ss:$0 sm:$0xff]  ;;  %s888_s9 = smov [#allocation2]  }
  0x85   :  { %v72_v8 = vmax.f32 %v69_v7, 0.0  ;;  %v839_v7 = vld [vmem:[%s1142_s7 + $0x1] ss:$0 sm:$0xff] }
  0x87   :  { %v73_v9 = vpack.c.bf16 %v72_v8, %v72_v8 }
  0x89   :  { %681 = vmatmul.msk.bf16.vlgmr.msra.gmra.mxu1 %vm92_vm1, %v73_v9 }
  0x8a   :  { %v70_v10 = vpop.f32.mrf.mxu0 }
  0x99   :  { %709 = vmatmul.msk.bf16.vlgmr.msrb.gmra.mxu1 %vm55_vm0, %v960_v2 }
 0x106   :  { %v105_v14 = vpop.f32.mrf.mxu1 }
 0x107   :  { %v106_v15 = vadd.f32 %v833_v13, %v105_v14 }
 0x109   :  { %v109_v16 = vmax.f32 %v106_v15, 0.0 }
 0x10b   :  { %v110_v17 = vpack.c.bf16 %v109_v16, %v109_v16 }
 0x10d   :  { %690 = vmatmul.msk.bf16.vlgmr.msra.gmra.mxu2 %vm92_vm1, %v110_v17 }
 0x10e   :  { %v107_v18 = vpop.f32.mrf.mxu1  ;;  %416 = vmatpush.bf16.msra.mxu2 %v407_v6 }
 0x116   :  { %v251_v38 = vpop.f32.mrf.mxu1 }
 0x11e   :  { %v253_v40 = vpop.f32.mrf.mxu1 }
 0x190   :  { %v141_v20 = vpop.f32.mrf.mxu2 }
 0x191   :  { %v142_v21 = vadd.f32 %v834_v19, %v141_v20  ;;  %v817_v20 = vld [vmem:[%s1139_s4 + $0x28] sm:$0xff] }
 0x193   :  { %v146_v22 = vmul.f32 0.5, %v142_v21  ;;  %593 = vrot.lane.b32.xlu2 %v142_v21, %s879_s20 }
 0x195   :  { %v147_v23 = vmul.f32 1.442695, %v146_v22  ;;  %v814_v22 = vld [vmem:[%s1145_s10 + $0x18] sm:$0xff] }
 0x196   :  { %395 = vmatpush.bf16.msra.mxu1 %v814_v22 }
 0x197   :  { %847 = vpow2.f32 %v147_v23  ;;  %v813_v23 = vld [vmem:[%s1145_s10 + $0x10] sm:$0xff] }
 0x198   :  { %v143_v24 = vpop.f32.mrf.mxu2 }
 0x199   :  { %v816_v24 = vld [vmem:[%s1139_s4 + $0x20] sm:$0xff] }
 0x19a   :  { %396 = vmatpush.bf16.msra.mxu1 %v813_v23 }
 0x19d   :  { %v848_v25 = vpop.eup %847 }
 0x19e   :  { %150 = vrot.lane.b32.xlu0 %v848_v25, %s880_s21  ;;  %v819_v25 = vld [vmem:[%s1141_s6 + $0x28] sm:$0xff] }
 0x19f   :  { %511 = vmatpush.bf16.msrb.mxu1 %v819_v25 }
 0x1a3   :  { %512 = vmatpush.bf16.msrb.mxu1 %v818_v41 }
 0x210   :  { %v151_v32 = vpop.permute.xlu0 %150 }
 0x211   :  { %v153_v33 = vmul.f32 %v151_v32, %v1005_v31 }
 0x213   :  { %v1008_v34 = vadd.f32 %v153_v33, %v142_v21 }
 0x215   :  { %v155_v35 = vpack.c.bf16 %v1008_v34, %v1008_v34 }
 0x217   :  { %691 = vmatmul.msk.bf16.vlgmr.msra.gmra.mxu3 %vm159_vm3, %v155_v35 }
 0x227   :  { %704 = vmatmul.msk.bf16.vlgmr.msrb.gmra.mxu3 %vm159_vm3, %v155_v35 }
 0x29a   :  { %v176_v43 = vpop.f32.mrf.mxu3 }
 0x29b   :  { %v177_v44 = vadd.f32 %v835_v42, %v176_v43  ;;  %v842_v42 = vld [vmem:[%s1146_s11 + $0x1] ss:$0 sm:$0xff] }
 0x29d   :  { %v180_v45 = vmax.f32 %v177_v44, 0.0 }
 0x29f   :  { %v181_v46 = vpack.c.bf16 %v180_v45, %v180_v45  ;;  %v843_v45 = vld [vmem:[%s1140_s5 + $0x2] ss:$0 sm:$0xff] }
 0x2a1   :  { %700 = vmatmul.msk.bf16.vlgmr.msrb.gmra.mxu0 %vm92_vm1, %v181_v46 }
 0x2a2   :  { %v178_v47 = vpop.f32.mrf.mxu3  ;;  %435 = vmatpush.bf16.msrb.mxu0 %v815_v5 }
 0x2aa   :  { %v232_v49 = vpop.f32.mrf.mxu3 }
 0x2ab   :  { %v252_v50 = vadd.f32 %v251_v38, %v232_v49 }
 0x2ad   :  { %v257_v51 = vadd.f32 %v836_v48, %v252_v50 }
 0x2af   :  { %v258_v52 = vmax.f32 %v257_v51, 0.0 }
 0x2b1   :  { %v259_v53 = vpack.c.bf16 %v258_v52, %v258_v52  ;;  %v844_v52 = vld [vmem:[%s1142_s7 + $0x2] ss:$0 sm:$0xff]  ;;  %s884_s7 = smov 112  }
 0x2b2   :  { %v234_v54 = vpop.f32.mrf.mxu3 }
 0x2b3   :  { %722 = vmatmul.msk.bf16.vlgmr.msrb.gmra.mxu2 %vm92_vm1, %v259_v53 }
 0x31e   :  { %v212_v58 = vpop.f32.mrf.mxu0 }
 0x31f   :  { %v213_v59 = vadd.f32 %v837_v57, %v212_v58 }
 0x321   :  { %597 = vrot.lane.b32.xlu2 %v213_v59, %s881_s0  ;;  %v786_v59 = vld [vmem:[%s1143_s8 + $0x8] sm:$0xf] }
 0x326   :  { %v214_v60 = vpop.f32.mrf.mxu0 }
 0x327   :  { %v540_v60 = vsel %vm163_vm2, %v786_v59, 0 }
 0x328   :  { %549 = vmatpush.bf16.msrb.mxu2 %v540_v60 }
 0x336   :  { %v291_v62 = vpop.f32.mrf.mxu2 }
 0x337   :  { %v292_v63 = vadd.f32 %v838_v61, %v291_v62 }
 0x339   :  { %v295_v0 = vmax.f32 %v292_v63, 0.0 }
 0x33b   :  { %v296_v1 = vpack.c.bf16 %v295_v0, %v295_v0 }
 0x33d   :  { %735 = vmatmul.msk.bf16.vlgmr.msra.gmra.mxu0 %vm92_vm1, %v296_v1 }
 0x33e   :  { %v293_v3 = vpop.f32.mrf.mxu2 }
 0x33f   :  { %v821_v3 = vld [vmem:[%s1145_s10 + $0x28] sm:$0xff] }
 0x340   :  { %585 = vmatpush.bf16.msra.mxu0 %v821_v3 }
 0x34d   :  { %759 = vmatmul.msk.bf16.vlgmr.msrb.gmra.mxu0 %vm55_vm0, %v960_v2  ;;  %v736_v2 = vld [vmem:[%s1143_s8 + $0x4] sm:$0xf] }
 0x34e   :  { %v350_v15 = vsel %vm163_vm2, %v736_v2, 0 }
 0x34f   :  { %359 = vmatpush.bf16.msra.mxu3 %v350_v15 }
 0x353   :  { %474 = vmatpush.bf16.msrb.mxu3 %v817_v20 }
 0x357   :  { %475 = vmatpush.bf16.msrb.mxu3 %v816_v24 }
 0x3ba   :  { %v328_v8 = vpop.f32.mrf.mxu0 }
 0x3bb   :  { %v1059_v9 = vadd.f32 %v839_v7, %v328_v8 }
 0x3bd   :  { %v332_v10 = vmul.f32 0.5, %v1059_v9 }
 0x3bf   :  { %v333_v11 = vmul.f32 1.442695, %v332_v10  ;;  %v846_v10 = vld [vmem:[%s1146_s11 + $0x2] ss:$0 sm:$0xff] }
 0x3c1   :  { %849 = vpow2.f32 %v333_v11 }
 0x3c2   :  { %v330_v12 = vpop.f32.mrf.mxu0 }
 0x3c7   :  { %v850_v13 = vpop.eup %849 }
 0x3c8   :  { %v335_v14 = vmul.f32 %v850_v13, %v1005_v31 }
 0x3ca   :  { %337 = vrot.lane.b32.xlu0 %v335_v14, %s880_s21  ;;  %v437_v19 = vpop.f32.mrf.mxu0  ;;  %v594_v14 = vpop.permute.xlu2 %593 }
 0x3cb   :  { %v624_v2 = vsel %vm159_vm3, %v1008_v34, %v594_v14 }
 0x3d2   :  { %v439_v21 = vpop.f32.mrf.mxu0  ;;  %v598_v15 = vpop.permute.xlu2 %597 }
 0x43c   :  { %v338_v16 = vpop.permute.xlu0 %337 }
 0x43d   :  { %v340_v17 = vadd.f32 %v338_v16, %v1059_v9 }
 0x43f   :  { %v341_v18 = vpack.c.bf16 %v340_v17, %v340_v17  ;;  %601 = vrot.lane.b32.xlu0 %v340_v17, %s882_s22  ;;  %v625_v17 = vsel %vm55_vm0, %v624_v2, %v594_v14 }
 0x441   :  { %737 = vmatmul.msk.bf16.vlgmr.msra.gmra.mxu3 %vm159_vm3, %v341_v18  ;;  %754 = vmatmul.msk.bf16.vlgmr.msra.gmra.mxu2 %vm159_vm3, %v341_v18 }
 0x4b1   :  { %v602_v16 = vpop.permute.xlu0 %601 }
 0x4c4   :  { %v361_v28 = vpop.f32.mrf.mxu3  ;;  %v418_v29 = vpop.f32.mrf.mxu2 }
 0x4c5   :  { %v362_v30 = vadd.f32 %v840_v26, %v361_v28  ;;  %v438_v32 = vadd.f32 %v437_v19, %v418_v29  ;;  %v627_v19 = vsel %vm626_vm4, %v625_v17, %v598_v15 }
 0x4c6   :  { %v629_v20 = vsel %vm628_vm5, %v627_v19, %v602_v16 }
 0x4c7   :  { %v365_v33 = vmax.f32 %v362_v30, 0.0  ;;  %v443_v35 = vadd.f32 %v841_v27, %v438_v32 }
 0x4c9   :  { %v366_v36 = vpack.c.bf16 %v365_v33, %v365_v33  ;;  %v444_v37 = vmax.f32 %v443_v35, 0.0 }
 0x4cb   :  { %v445_v38 = vpack.c.bf16 %v444_v37, %v444_v37  ;;  %750 = vmatmul.msk.bf16.vlgmr.msra.gmra.mxu1 %vm92_vm1, %v366_v36 }
 0x4cc   :  { %v363_v39 = vpop.f32.mrf.mxu3  ;;  %v420_v40 = vpop.f32.mrf.mxu2 }
 0x4cd   :  { %772 = vmatmul.msk.bf16.vlgmr.msrb.gmra.mxu3 %vm92_vm1, %v445_v38 }
 0x548   :  { %v398_v43 = vpop.f32.mrf.mxu1 }
 0x549   :  { %v399_v44 = vadd.f32 %v842_v42, %v398_v43 }
 0x54b   :  { %609 = vrot.lane.b32.xlu2 %v399_v44, %s883_s2 }
 0x550   :  { %v400_v46 = vpop.f32.mrf.mxu1  ;;  %v477_v47 = vpop.f32.mrf.mxu3 }
 0x551   :  { %v478_v48 = vadd.f32 %v843_v45, %v477_v47 }
 0x553   :  { %v481_v49 = vmax.f32 %v478_v48, 0.0 }
 0x555   :  { %v482_v50 = vpack.c.bf16 %v481_v49, %v481_v49 }
 0x557   :  { %785 = vmatmul.msk.bf16.vlgmr.msrb.gmra.mxu1 %vm92_vm1, %v482_v50 }
 0x558   :  { %v479_v51 = vpop.f32.mrf.mxu3 }
 0x5a5   :  { %v610_v24 = vpop.permute.xlu2 %609 }
 0x5d4   :  { %v514_v53 = vpop.f32.mrf.mxu1 }
 0x5d5   :  { %v515_v54 = vadd.f32 %v844_v52, %v514_v53 }
 0x5d7   :  { %v518_v55 = vmul.f32 0.5, %v515_v54 }
 0x5d9   :  { %v519_v56 = vmul.f32 1.442695, %v518_v55 }
 0x5db   :  { %851 = vpow2.f32 %v519_v56 }
 0x5dc   :  { %v516_v57 = vpop.f32.mrf.mxu1 }
 0x5e1   :  { %v852_v58 = vpop.eup %851 }
 0x5e2   :  { %522 = vrot.lane.b32.xlu1 %v852_v58, %s879_s20  ;;  %s887_s20 = smov 96  }
 0x654   :  { %v523_v61 = vpop.permute.xlu1 %522 }
 0x655   :  { %v525_v62 = vmul.f32 %v523_v61, %v1005_v31  ;;  %v820_v31 = vld [vmem:[%s1145_s10 + $0x20] sm:$0xff]  ;;  %s657_s10 = sshll.u32 %s888_s9, 4  ;;  %s658_s10 = int_to_ptr.vmem [resolvable:$true] %s657_s10 }
 0x656   :  { %586 = vmatpush.bf16.msra.mxu0 %v820_v31 }
 0x657   :  { %527 = vrot.lane.b32.xlu1 %v525_v62, %s884_s7 }
 0x65f   :  { %605 = vrot.lane.b32.xlu1 %v1059_v9, %s885_s25 }
 0x667   :  { %617 = vrot.lane.b32.xlu1 %v515_v54, %s886_s26 }
 0x6c9   :  { %v528_v63 = vpop.permute.xlu1 %527 }
 0x6ca   :  { %v530_v0 = vadd.f32 %v528_v63, %v515_v54 }
 0x6cc   :  { %v531_v1 = vpack.c.bf16 %v530_v0, %v530_v0  ;;  %613 = vrot.lane.b32.xlu0 %v530_v0, %s887_s20 }
 0x6ce   :  { %787 = vmatmul.msk.bf16.vlgmr.msrb.gmra.mxu2 %vm159_vm3, %v531_v1 }
 0x6d1   :  { %v606_v18 = vpop.permute.xlu1 %605 }
 0x6d2   :  { %v631_v21 = vsel %vm630_vm6, %v629_v20, %v606_v18 }
 0x6d3   :  { %v633_v22 = vsel %vm632_vm7, %v631_v21, %v606_v18 }
 0x6d4   :  { %v635_v25 = vsel %vm634_vm8, %v633_v22, %v610_v24 }
 0x6d9   :  { %v618_v26 = vpop.permute.xlu1 %617 }
 0x73e   :  { %v614_v23 = vpop.permute.xlu0 %613 }
 0x73f   :  { %v637_v34 = vsel %vm636_vm9, %v635_v25, %v614_v23 }
 0x740   :  { %v639_v27 = vsel %vm638_vm10, %v637_v34, %v618_v26 }
 0x741   :  { %v641_v28 = vsel %vm640_vm11, %v639_v27, %v618_v26 }
 0x751   :  { %v551_v5 = vpop.f32.mrf.mxu2 }
 0x752   :  { %v552_v6 = vadd.f32 %v845_v4, %v551_v5 }
 0x754   :  { %v555_v7 = vmax.f32 %v552_v6, 0.0 }
 0x756   :  { %v556_v8 = vpack.c.bf16 %v555_v7, %v555_v7 }
 0x758   :  { %800 = vmatmul.msk.bf16.vlgmr.msra.gmra.mxu0 %vm92_vm1, %v556_v8 }
 0x759   :  { %v553_v9 = vpop.f32.mrf.mxu2 }
 0x7d5   :  { %v588_v11 = vpop.f32.mrf.mxu0 }
 0x7d6   :  { %v589_v12 = vadd.f32 %v846_v10, %v588_v11 }
 0x7d8   :  { %621 = vrot.lane.b32.xlu2 %v589_v12, %s880_s21 }
 0x7dd   :  { %v590_v13 = vpop.f32.mrf.mxu0 }
 0x832   :  { %v622_v29 = vpop.permute.xlu2 %621 }
 0x833   :  { %v643_v30 = vsel %vm642_vm12, %v641_v28, %v622_v29  ;;  %v645_v32 = vrot.slane %v622_v29, 6 }
 0x835   :  { %v647_v33 = vsel %vm646_vm13, %v643_v30, %v645_v32 }
 0x836   :  { %651 = vst.msk [vmem:[#allocation2] sm:$0xf] %vm650_vm15, %v647_v33 }
 0x837   :  { %662 = dma.vmem_to_hbm [thread:$0]  %s658_s10, 64, %s660_s14, [#allocation3]  }
 0x838   :  { %877 = dma.done.wait [#allocation3], 64  }
 0x839   :  { %878 = vsyncadd [#allocation3], 4294967232 }
 0x83a   :  { %667 = vsyncpa [#allocation3], 1 }

</bundles_post_ra>
